<compile_context>
chip_gen: v7x
topology: tpu7x:2x2x1
jax: 0.10.0
libtpu: 0.0.40
codegen_flags: <defaults>
</compile_context>

<pallas_src>
import functools

import jax
import jax.numpy as jnp
from jax.experimental import pallas as pl
from jax.experimental.pallas import tpu as pltpu

# ---------------- configuration (mirrors Mapping.__init__ defaults) ----------
IN_DIM = 32
OUT_DIM = 64
NUM_LAYERS = 8
SLOPE = 0.2
LAST_ACTIVATION = True

BATCH = 16


def _leaky_relu(y, slope):
    return jnp.where(y >= 0, y, slope * y)


def mapping_kernel(x_ref, wh_ref, bh_ref, wl_ref, bl_ref, o_ref,
                   *, num_hidden, slope, last_activation):
    """Fused forward for the whole Mapping stack in a single grid step.

    x_ref : (B, in_dim)                   f32 activations
    wh_ref: (num_hidden, in_dim, in_dim)  bf16 hidden weights (pre-transposed)
    bh_ref: (num_hidden, 1, in_dim)       f32 hidden biases
    wl_ref: (in_dim, out_dim)             bf16 last weight (pre-transposed)
    bl_ref: (1, out_dim)                  f32 last bias
    o_ref : (B, out_dim)                  f32
    """
    x = x_ref[...].astype(jnp.float32)
    # Hidden blocks: Linear -> LeakyReLU -> Dropout(eval = identity)
    for i in range(num_hidden):                    # static unroll
        y = jnp.dot(x.astype(jnp.bfloat16), wh_ref[i],
                    preferred_element_type=jnp.float32)   # MXU, f32 accumulate
        x = _leaky_relu(y + bh_ref[i], slope)              # VPU work stays f32
    # Last block
    y = jnp.dot(x.astype(jnp.bfloat16), wl_ref[...],
                preferred_element_type=jnp.float32)
    y = y + bl_ref[...]
    if last_activation:
        y = _leaky_relu(y, slope)
    o_ref[...] = y.astype(o_ref.dtype)


@functools.partial(jax.jit, static_argnames=("slope", "last_activation"))
def mapping_forward(x, w_hidden, b_hidden, w_last, b_last,
                    slope=SLOPE, last_activation=LAST_ACTIVATION):
    """Single-dispatch forward. Params are expected pre-prepared (bf16 weights,
    f32 biases) via prepare_params(); no padding / slicing happens here."""
    B, in_dim = x.shape
    num_hidden = w_hidden.shape[0]
    out_dim = w_last.shape[1]

    kernel = functools.partial(
        mapping_kernel,
        num_hidden=num_hidden,
        slope=slope,
        last_activation=last_activation,
    )

    return pl.pallas_call(
        kernel,
        out_shape=jax.ShapeDtypeStruct((B, out_dim), x.dtype),
        grid_spec=pl.GridSpec(
            grid=(1,),                                   # single step: no per-step
            in_specs=[                                   # overhead, no revisits
                pl.BlockSpec((B, in_dim), lambda i: (0, 0)),
                pl.BlockSpec((num_hidden, in_dim, in_dim), lambda i: (0, 0, 0)),
                pl.BlockSpec((num_hidden, 1, in_dim), lambda i: (0, 0, 0)),
                pl.BlockSpec((in_dim, out_dim), lambda i: (0, 0)),
                pl.BlockSpec((1, out_dim), lambda i: (0, 0)),
            ],
            out_specs=pl.BlockSpec((B, out_dim), lambda i: (0, 0)),
        ),
        compiler_params=pltpu.CompilerParams(
            dimension_semantics=("arbitrary",)),
    )(x, w_hidden, b_hidden, w_last, b_last)


def init_params(key, in_dim, out_dim, num_layers):
    """Deterministic Kaiming-normal weights (gain=sqrt(2), fan_in), zero bias.

    Weights are stored pre-transposed as (fan_in, fan_out) for y = x @ W.
    """
    num_hidden = num_layers - 1
    k_h, k_l = jax.random.split(key)
    std = (2.0 / in_dim) ** 0.5
    w_hidden = std * jax.random.normal(
        k_h, (num_hidden, in_dim, in_dim), dtype=jnp.float32)
    b_hidden = jnp.zeros((num_hidden, 1, in_dim), dtype=jnp.float32)
    w_last = std * jax.random.normal(k_l, (in_dim, out_dim), dtype=jnp.float32)
    b_last = jnp.zeros((1, out_dim), dtype=jnp.float32)
    return w_hidden, b_hidden, w_last, b_last


def prepare_params(w_hidden, b_hidden, w_last, b_last):
    """One-time param prep (done OUTSIDE the per-call path): weights -> bf16
    to halve the dominant byte stream; biases stay f32 (exact, tiny)."""
    return (w_hidden.astype(jnp.bfloat16),
            b_hidden.astype(jnp.float32),
            w_last.astype(jnp.bfloat16),
            b_last.astype(jnp.float32))


def mapping_reference(x, w_hidden, b_hidden, w_last, b_last,
                      *, slope=SLOPE, last_activation=LAST_ACTIVATION):
    """Pure-JAX reference using the same bf16-operand / f32-accumulate math."""
    x = x.astype(jnp.float32)
    wh = w_hidden.astype(jnp.bfloat16)
    wl = w_last.astype(jnp.bfloat16)
    for i in range(wh.shape[0]):
        y = jnp.dot(x.astype(jnp.bfloat16), wh[i],
                    preferred_element_type=jnp.float32) + b_hidden[i]
        x = _leaky_relu(y, slope)
    y = jnp.dot(x.astype(jnp.bfloat16), wl,
                preferred_element_type=jnp.float32) + b_last
    if last_activation:
        y = _leaky_relu(y, slope)
    return y


if __name__ == "__main__":
    key = jax.random.PRNGKey(0)
    k_x, k_p = jax.random.split(key)

    x = jax.random.normal(k_x, (BATCH, IN_DIM), dtype=jnp.float32)
    params_f32 = init_params(k_p, IN_DIM, OUT_DIM, NUM_LAYERS)

    # Prepared (bf16-weight) params are built once and reused for every call.
    wh, bh, wl, bl = prepare_params(*params_f32)

    out = mapping_forward(x, wh, bh, wl, bl)
    out = jax.block_until_ready(out)

    ref = mapping_reference(x, *params_f32)
    assert out.shape == (BATCH, OUT_DIM)
    assert out.dtype == jnp.float32
    assert jnp.allclose(out, ref, atol=1e-3, rtol=1e-3), "mismatch vs reference"

    print("KERNEL_OK")
</pallas_src>

<mosaic_0001>
module attributes {stable_mosaic.version = 11 : i64} {
  func.func @mapping_kernel(%arg0: i32, %arg1: memref<16x32xf32, #tpu.memory_space<vmem>>, %arg2: memref<7x32x32xbf16, #tpu.memory_space<vmem>>, %arg3: memref<7x1x32xf32, #tpu.memory_space<vmem>>, %arg4: memref<32x64xbf16, #tpu.memory_space<vmem>>, %arg5: memref<1x64xf32, #tpu.memory_space<vmem>>, %arg6: memref<16x64xf32, #tpu.memory_space<vmem>>) attributes {dimension_semantics = [#tpu.dimension_semantics<arbitrary>], iteration_bounds = array<i64: 1>, scalar_prefetch = 0 : i64, scratch_operands = 0 : i64, tpu.core_type = #tpu.core_type<tc>, window_params = [{pipeline_mode = #tpu.pipeline_mode<synchronous>, transform_indices = @transform_0, window_bounds = array<i64: 16, 32>}, {pipeline_mode = #tpu.pipeline_mode<synchronous>, transform_indices = @transform_1, window_bounds = array<i64: 7, 32, 32>}, {pipeline_mode = #tpu.pipeline_mode<synchronous>, transform_indices = @transform_2, window_bounds = array<i64: 7, 1, 32>}, {pipeline_mode = #tpu.pipeline_mode<synchronous>, transform_indices = @transform_3, window_bounds = array<i64: 32, 64>}, {pipeline_mode = #tpu.pipeline_mode<synchronous>, transform_indices = @transform_4, window_bounds = array<i64: 1, 64>}, {pipeline_mode = #tpu.pipeline_mode<synchronous>, transform_indices = @transform_5, window_bounds = array<i64: 16, 64>}]} {
    %c0 = arith.constant 0 : index
    %c0_0 = arith.constant 0 : index
    %0 = vector.load %arg1[%c0, %c0_0] : memref<16x32xf32, #tpu.memory_space<vmem>>, vector<16x32xf32>
    %1 = arith.truncf %0 : vector<16x32xf32> to vector<16x32xbf16>
    %c0_1 = arith.constant 0 : index
    %c0_2 = arith.constant 0 : index
    %c0_3 = arith.constant 0 : index
    %2 = vector.load %arg2[%c0_1, %c0_2, %c0_3] : memref<7x32x32xbf16, #tpu.memory_space<vmem>>, vector<1x32x32xbf16>
    %3 = vector.shape_cast %2 : vector<1x32x32xbf16> to vector<32x32xbf16>
    %cst = arith.constant dense<0.000000e+00> : vector<16x32xf32>
    %4 = tpu.matmul %1, %3, %cst {dimension_numbers = #tpu.dot_dimension_numbers<[1], [0], [0], [1], [0, 0, 1, 1], [], []>} : vector<16x32xbf16>, vector<32x32xbf16>, vector<16x32xf32> -> vector<16x32xf32>
    %c0_4 = arith.constant 0 : index
    %c0_5 = arith.constant 0 : index
    %c0_6 = arith.constant 0 : index
    %5 = vector.load %arg3[%c0_4, %c0_5, %c0_6] : memref<7x1x32xf32, #tpu.memory_space<vmem>>, vector<1x1x32xf32>
    %6 = vector.shape_cast %5 : vector<1x1x32xf32> to vector<1x32xf32>
    %7 = vector.broadcast %6 : vector<1x32xf32> to vector<16x32xf32>
    %8 = arith.addf %4, %7 : vector<16x32xf32>
    %cst_7 = arith.constant 0.000000e+00 : f32
    %9 = vector.broadcast %cst_7 : f32 to vector<16x32xf32>
    %10 = arith.cmpf oge, %8, %9 : vector<16x32xf32>
    %cst_8 = arith.constant 2.000000e-01 : f32
    %11 = vector.broadcast %cst_8 : f32 to vector<16x32xf32>
    %12 = arith.mulf %11, %8 : vector<16x32xf32>
    %13 = arith.select %10, %8, %12 : vector<16x32xi1>, vector<16x32xf32>
    %14 = arith.truncf %13 : vector<16x32xf32> to vector<16x32xbf16>
    %c1 = arith.constant 1 : index
    %c0_9 = arith.constant 0 : index
    %c0_10 = arith.constant 0 : index
    %15 = vector.load %arg2[%c1, %c0_9, %c0_10] : memref<7x32x32xbf16, #tpu.memory_space<vmem>>, vector<1x32x32xbf16>
    %16 = vector.shape_cast %15 : vector<1x32x32xbf16> to vector<32x32xbf16>
    %cst_11 = arith.constant dense<0.000000e+00> : vector<16x32xf32>
    %17 = tpu.matmul %14, %16, %cst_11 {dimension_numbers = #tpu.dot_dimension_numbers<[1], [0], [0], [1], [0, 0, 1, 1], [], []>} : vector<16x32xbf16>, vector<32x32xbf16>, vector<16x32xf32> -> vector<16x32xf32>
    %c1_12 = arith.constant 1 : index
    %c0_13 = arith.constant 0 : index
    %c0_14 = arith.constant 0 : index
    %18 = vector.load %arg3[%c1_12, %c0_13, %c0_14] : memref<7x1x32xf32, #tpu.memory_space<vmem>>, vector<1x1x32xf32>
    %19 = vector.shape_cast %18 : vector<1x1x32xf32> to vector<1x32xf32>
    %20 = vector.broadcast %19 : vector<1x32xf32> to vector<16x32xf32>
    %21 = arith.addf %17, %20 : vector<16x32xf32>
    %cst_15 = arith.constant 0.000000e+00 : f32
    %22 = vector.broadcast %cst_15 : f32 to vector<16x32xf32>
    %23 = arith.cmpf oge, %21, %22 : vector<16x32xf32>
    %cst_16 = arith.constant 2.000000e-01 : f32
    %24 = vector.broadcast %cst_16 : f32 to vector<16x32xf32>
    %25 = arith.mulf %24, %21 : vector<16x32xf32>
    %26 = arith.select %23, %21, %25 : vector<16x32xi1>, vector<16x32xf32>
    %27 = arith.truncf %26 : vector<16x32xf32> to vector<16x32xbf16>
    %c2 = arith.constant 2 : index
    %c0_17 = arith.constant 0 : index
    %c0_18 = arith.constant 0 : index
    %28 = vector.load %arg2[%c2, %c0_17, %c0_18] : memref<7x32x32xbf16, #tpu.memory_space<vmem>>, vector<1x32x32xbf16>
    %29 = vector.shape_cast %28 : vector<1x32x32xbf16> to vector<32x32xbf16>
    %cst_19 = arith.constant dense<0.000000e+00> : vector<16x32xf32>
    %30 = tpu.matmul %27, %29, %cst_19 {dimension_numbers = #tpu.dot_dimension_numbers<[1], [0], [0], [1], [0, 0, 1, 1], [], []>} : vector<16x32xbf16>, vector<32x32xbf16>, vector<16x32xf32> -> vector<16x32xf32>
    %c2_20 = arith.constant 2 : index
    %c0_21 = arith.constant 0 : index
    %c0_22 = arith.constant 0 : index
    %31 = vector.load %arg3[%c2_20, %c0_21, %c0_22] : memref<7x1x32xf32, #tpu.memory_space<vmem>>, vector<1x1x32xf32>
    %32 = vector.shape_cast %31 : vector<1x1x32xf32> to vector<1x32xf32>
    %33 = vector.broadcast %32 : vector<1x32xf32> to vector<16x32xf32>
    %34 = arith.addf %30, %33 : vector<16x32xf32>
    %cst_23 = arith.constant 0.000000e+00 : f32
    %35 = vector.broadcast %cst_23 : f32 to vector<16x32xf32>
    %36 = arith.cmpf oge, %34, %35 : vector<16x32xf32>
    %cst_24 = arith.constant 2.000000e-01 : f32
    %37 = vector.broadcast %cst_24 : f32 to vector<16x32xf32>
    %38 = arith.mulf %37, %34 : vector<16x32xf32>
    %39 = arith.select %36, %34, %38 : vector<16x32xi1>, vector<16x32xf32>
    %40 = arith.truncf %39 : vector<16x32xf32> to vector<16x32xbf16>
    %c3 = arith.constant 3 : index
    %c0_25 = arith.constant 0 : index
    %c0_26 = arith.constant 0 : index
    %41 = vector.load %arg2[%c3, %c0_25, %c0_26] : memref<7x32x32xbf16, #tpu.memory_space<vmem>>, vector<1x32x32xbf16>
    %42 = vector.shape_cast %41 : vector<1x32x32xbf16> to vector<32x32xbf16>
    %cst_27 = arith.constant dense<0.000000e+00> : vector<16x32xf32>
    %43 = tpu.matmul %40, %42, %cst_27 {dimension_numbers = #tpu.dot_dimension_numbers<[1], [0], [0], [1], [0, 0, 1, 1], [], []>} : vector<16x32xbf16>, vector<32x32xbf16>, vector<16x32xf32> -> vector<16x32xf32>
    %c3_28 = arith.constant 3 : index
    %c0_29 = arith.constant 0 : index
    %c0_30 = arith.constant 0 : index
    %44 = vector.load %arg3[%c3_28, %c0_29, %c0_30] : memref<7x1x32xf32, #tpu.memory_space<vmem>>, vector<1x1x32xf32>
    %45 = vector.shape_cast %44 : vector<1x1x32xf32> to vector<1x32xf32>
    %46 = vector.broadcast %45 : vector<1x32xf32> to vector<16x32xf32>
    %47 = arith.addf %43, %46 : vector<16x32xf32>
    %cst_31 = arith.constant 0.000000e+00 : f32
    %48 = vector.broadcast %cst_31 : f32 to vector<16x32xf32>
    %49 = arith.cmpf oge, %47, %48 : vector<16x32xf32>
    %cst_32 = arith.constant 2.000000e-01 : f32
    %50 = vector.broadcast %cst_32 : f32 to vector<16x32xf32>
    %51 = arith.mulf %50, %47 : vector<16x32xf32>
    %52 = arith.select %49, %47, %51 : vector<16x32xi1>, vector<16x32xf32>
    %53 = arith.truncf %52 : vector<16x32xf32> to vector<16x32xbf16>
    %c4 = arith.constant 4 : index
    %c0_33 = arith.constant 0 : index
    %c0_34 = arith.constant 0 : index
    %54 = vector.load %arg2[%c4, %c0_33, %c0_34] : memref<7x32x32xbf16, #tpu.memory_space<vmem>>, vector<1x32x32xbf16>
    %55 = vector.shape_cast %54 : vector<1x32x32xbf16> to vector<32x32xbf16>
    %cst_35 = arith.constant dense<0.000000e+00> : vector<16x32xf32>
    %56 = tpu.matmul %53, %55, %cst_35 {dimension_numbers = #tpu.dot_dimension_numbers<[1], [0], [0], [1], [0, 0, 1, 1], [], []>} : vector<16x32xbf16>, vector<32x32xbf16>, vector<16x32xf32> -> vector<16x32xf32>
    %c4_36 = arith.constant 4 : index
    %c0_37 = arith.constant 0 : index
    %c0_38 = arith.constant 0 : index
    %57 = vector.load %arg3[%c4_36, %c0_37, %c0_38] : memref<7x1x32xf32, #tpu.memory_space<vmem>>, vector<1x1x32xf32>
    %58 = vector.shape_cast %57 : vector<1x1x32xf32> to vector<1x32xf32>
    %59 = vector.broadcast %58 : vector<1x32xf32> to vector<16x32xf32>
    %60 = arith.addf %56, %59 : vector<16x32xf32>
    %cst_39 = arith.constant 0.000000e+00 : f32
    %61 = vector.broadcast %cst_39 : f32 to vector<16x32xf32>
    %62 = arith.cmpf oge, %60, %61 : vector<16x32xf32>
    %cst_40 = arith.constant 2.000000e-01 : f32
    %63 = vector.broadcast %cst_40 : f32 to vector<16x32xf32>
    %64 = arith.mulf %63, %60 : vector<16x32xf32>
    %65 = arith.select %62, %60, %64 : vector<16x32xi1>, vector<16x32xf32>
    %66 = arith.truncf %65 : vector<16x32xf32> to vector<16x32xbf16>
    %c5 = arith.constant 5 : index
    %c0_41 = arith.constant 0 : index
    %c0_42 = arith.constant 0 : index
    %67 = vector.load %arg2[%c5, %c0_41, %c0_42] : memref<7x32x32xbf16, #tpu.memory_space<vmem>>, vector<1x32x32xbf16>
    %68 = vector.shape_cast %67 : vector<1x32x32xbf16> to vector<32x32xbf16>
    %cst_43 = arith.constant dense<0.000000e+00> : vector<16x32xf32>
    %69 = tpu.matmul %66, %68, %cst_43 {dimension_numbers = #tpu.dot_dimension_numbers<[1], [0], [0], [1], [0, 0, 1, 1], [], []>} : vector<16x32xbf16>, vector<32x32xbf16>, vector<16x32xf32> -> vector<16x32xf32>
    %c5_44 = arith.constant 5 : index
    %c0_45 = arith.constant 0 : index
    %c0_46 = arith.constant 0 : index
    %70 = vector.load %arg3[%c5_44, %c0_45, %c0_46] : memref<7x1x32xf32, #tpu.memory_space<vmem>>, vector<1x1x32xf32>
    %71 = vector.shape_cast %70 : vector<1x1x32xf32> to vector<1x32xf32>
    %72 = vector.broadcast %71 : vector<1x32xf32> to vector<16x32xf32>
    %73 = arith.addf %69, %72 : vector<16x32xf32>
    %cst_47 = arith.constant 0.000000e+00 : f32
    %74 = vector.broadcast %cst_47 : f32 to vector<16x32xf32>
    %75 = arith.cmpf oge, %73, %74 : vector<16x32xf32>
    %cst_48 = arith.constant 2.000000e-01 : f32
    %76 = vector.broadcast %cst_48 : f32 to vector<16x32xf32>
    %77 = arith.mulf %76, %73 : vector<16x32xf32>
    %78 = arith.select %75, %73, %77 : vector<16x32xi1>, vector<16x32xf32>
    %79 = arith.truncf %78 : vector<16x32xf32> to vector<16x32xbf16>
    %c6 = arith.constant 6 : index
    %c0_49 = arith.constant 0 : index
    %c0_50 = arith.constant 0 : index
    %80 = vector.load %arg2[%c6, %c0_49, %c0_50] : memref<7x32x32xbf16, #tpu.memory_space<vmem>>, vector<1x32x32xbf16>
    %81 = vector.shape_cast %80 : vector<1x32x32xbf16> to vector<32x32xbf16>
    %cst_51 = arith.constant dense<0.000000e+00> : vector<16x32xf32>
    %82 = tpu.matmul %79, %81, %cst_51 {dimension_numbers = #tpu.dot_dimension_numbers<[1], [0], [0], [1], [0, 0, 1, 1], [], []>} : vector<16x32xbf16>, vector<32x32xbf16>, vector<16x32xf32> -> vector<16x32xf32>
    %c6_52 = arith.constant 6 : index
    %c0_53 = arith.constant 0 : index
    %c0_54 = arith.constant 0 : index
    %83 = vector.load %arg3[%c6_52, %c0_53, %c0_54] : memref<7x1x32xf32, #tpu.memory_space<vmem>>, vector<1x1x32xf32>
    %84 = vector.shape_cast %83 : vector<1x1x32xf32> to vector<1x32xf32>
    %85 = vector.broadcast %84 : vector<1x32xf32> to vector<16x32xf32>
    %86 = arith.addf %82, %85 : vector<16x32xf32>
    %cst_55 = arith.constant 0.000000e+00 : f32
    %87 = vector.broadcast %cst_55 : f32 to vector<16x32xf32>
    %88 = arith.cmpf oge, %86, %87 : vector<16x32xf32>
    %cst_56 = arith.constant 2.000000e-01 : f32
    %89 = vector.broadcast %cst_56 : f32 to vector<16x32xf32>
    %90 = arith.mulf %89, %86 : vector<16x32xf32>
    %91 = arith.select %88, %86, %90 : vector<16x32xi1>, vector<16x32xf32>
    %92 = arith.truncf %91 : vector<16x32xf32> to vector<16x32xbf16>
    %c0_57 = arith.constant 0 : index
    %c0_58 = arith.constant 0 : index
    %93 = vector.load %arg4[%c0_57, %c0_58] : memref<32x64xbf16, #tpu.memory_space<vmem>>, vector<32x64xbf16>
    %cst_59 = arith.constant dense<0.000000e+00> : vector<16x64xf32>
    %94 = tpu.matmul %92, %93, %cst_59 {dimension_numbers = #tpu.dot_dimension_numbers<[1], [0], [0], [1], [0, 0, 1, 1], [], []>} : vector<16x32xbf16>, vector<32x64xbf16>, vector<16x64xf32> -> vector<16x64xf32>
    %c0_60 = arith.constant 0 : index
    %c0_61 = arith.constant 0 : index
    %95 = vector.load %arg5[%c0_60, %c0_61] : memref<1x64xf32, #tpu.memory_space<vmem>>, vector<1x64xf32>
    %96 = vector.broadcast %95 : vector<1x64xf32> to vector<16x64xf32>
    %97 = arith.addf %94, %96 : vector<16x64xf32>
    %cst_62 = arith.constant 0.000000e+00 : f32
    %98 = vector.broadcast %cst_62 : f32 to vector<16x64xf32>
    %99 = arith.cmpf oge, %97, %98 : vector<16x64xf32>
    %cst_63 = arith.constant 2.000000e-01 : f32
    %100 = vector.broadcast %cst_63 : f32 to vector<16x64xf32>
    %101 = arith.mulf %100, %97 : vector<16x64xf32>
    %102 = arith.select %99, %97, %101 : vector<16x64xi1>, vector<16x64xf32>
    %c0_64 = arith.constant 0 : index
    %c0_65 = arith.constant 0 : index
    %103 = vector.load %arg6[%c0_64, %c0_65] : memref<16x64xf32, #tpu.memory_space<vmem>>, vector<16x64xf32>
    tpu.vector_store %arg6[%c0_64, %c0_65], %102 {strides = array<i32>} : memref<16x64xf32, #tpu.memory_space<vmem>>, vector<16x64xf32>,
    return
  }
  func.func @transform_0(%arg0: i32) -> (i32, i32) {
    %c0_i32 = arith.constant 0 : i32
    %c0_i32_0 = arith.constant 0 : i32
    %c0_i32_1 = arith.constant 0 : i32
    return %c0_i32, %c0_i32_0 : i32, i32
  }
  func.func @transform_1(%arg0: i32) -> (i32, i32, i32) {
    %c0_i32 = arith.constant 0 : i32
    %c0_i32_0 = arith.constant 0 : i32
    %c0_i32_1 = arith.constant 0 : i32
    %c0_i32_2 = arith.constant 0 : i32
    return %c0_i32, %c0_i32_0, %c0_i32_1 : i32, i32, i32
  }
  func.func @transform_2(%arg0: i32) -> (i32, i32, i32) {
    %c0_i32 = arith.constant 0 : i32
    %c0_i32_0 = arith.constant 0 : i32
    %c0_i32_1 = arith.constant 0 : i32
    %c0_i32_2 = arith.constant 0 : i32
    return %c0_i32, %c0_i32_0, %c0_i32_1 : i32, i32, i32
  }
  func.func @transform_3(%arg0: i32) -> (i32, i32) {
    %c0_i32 = arith.constant 0 : i32
    %c0_i32_0 = arith.constant 0 : i32
    %c0_i32_1 = arith.constant 0 : i32
    return %c0_i32, %c0_i32_0 : i32, i32
  }
  func.func @transform_4(%arg0: i32) -> (i32, i32) {
    %c0_i32 = arith.constant 0 : i32
    %c0_i32_0 = arith.constant 0 : i32
    %c0_i32_1 = arith.constant 0 : i32
    return %c0_i32, %c0_i32_0 : i32, i32
  }
  func.func @transform_5(%arg0: i32) -> (i32, i32) {
    %c0_i32 = arith.constant 0 : i32
    %c0_i32_0 = arith.constant 0 : i32
    %c0_i32_1 = arith.constant 0 : i32
    return %c0_i32, %c0_i32_0 : i32, i32
  }
}

</mosaic_0001>

<bundles_post_ra>
// kernel: mapping_forward.1
= control target key start
LH: loop header
LB: loop body
LE: loop exit
PB: predicated region body
PF: predicated region fallthrough
CT: control target
= control target key end

     0   :  { %10 = vsyncpa [#allocation3], 0  ;;  %s1101_s0 = inlined_call_operand.hbm [shape: f32[16,32], index: 0, kind: input, shape index: {}]   ;;  %s1102_s1 = inlined_call_operand.hbm [shape: bf16[7,32,32], index: 1, kind: input, shape index: {}]   ;;  %s1103_s2 = inlined_call_operand.vmem [shape: f32[7,1,32], index: 2, kind: input, shape index: {}]   ;;  %s1104_s3 = inlined_call_operand.hbm [shape: bf16[32,64], index: 3, kind: input, shape index: {}]   ;;  %s1105_s4 = inlined_call_operand.vmem [shape: f32[1,64], index: 4, kind: input, shape index: {}]   ;;  %s1106_s5 = inlined_call_operand.hbm [shape: f32[16,64], index: 5, kind: output, shape index: {}]  }
   0x1   :  { %11 = vsyncpa [#allocation6], 0 }
   0x2   :  { %12 = vsyncpa [#allocation4], 0  ;;  %s937_s18 = smov [#allocation5]   ;;  %s843_s22 = scalar_lea.hbm %s1102_s1, 1792 }
   0x3   :  { %s30_s19 = sshll.u32 %s937_s18, 4  ;;  %p844_p0 = scmp.ne.s32.totalorder %s1102_s1, %s843_s22  ;;  %s31_s19 = int_to_ptr.vmem [resolvable:$true] %s30_s19 }
   0x4   :  { %p847_p1 = scmp.lt.u32.totalorder %s843_s22, %s1102_s1 }
   0x6   :  { %p849_p2 = pnand %p847_p1, %p844_p0 }
   0x8   :  { %852 = shalt.err (!%p849_p2)
}
   0x9   :  { %s853_s27 = scalar_lea.vmem %s31_s19, 1792  ;;  %p858_p4 = scmp.lt.s32.totalorder %s31_s19, %s31_s19 }
   0xa   :  { %p854_p3 = scmp.ne.s32.totalorder %s31_s19, %s853_s27  ;;  %p859_p5 = scmp.lt.s32.totalorder %s853_s27, %s853_s27 }
   0xc   :  { %p860_p6 = por %p859_p5, %p858_p4 }
   0xe   :  { %p861_p7 = pnand %p860_p6, %p854_p3 }
  0x10   :  { %864 = shalt.err (!%p861_p7)
}
  0x11   :  { %s938_s28 = smov 64   ;;  %s939_s29 = smov 4  }
  0x12   :  { %36 = dma.hbm_to_vmem [thread:$0]  %s1102_s1, 1792, %s31_s19, [#allocation6], %s938_s28, %s938_s28, %s939_s29  }
  0x13   :  { %s940_s7 = smov [#allocation2]   ;;  %s865_s11 = scalar_lea.hbm %s1101_s0, 256 }
  0x14   :  { %s18_s8 = sshll.u32 %s940_s7, 4  ;;  %p866_p8 = scmp.ne.s32.totalorder %s1101_s0, %s865_s11  ;;  %s19_s8 = int_to_ptr.vmem [resolvable:$true] %s18_s8 }
  0x15   :  { %p869_p9 = scmp.lt.u32.totalorder %s865_s11, %s1101_s0 }
  0x17   :  { %p871_p10 = pnand %p869_p9, %p866_p8 }
  0x19   :  { %874 = shalt.err (!%p871_p10)
}
  0x1a   :  { %s875_s16 = scalar_lea.vmem %s19_s8, 256  ;;  %p880_p12 = scmp.lt.s32.totalorder %s19_s8, %s19_s8 }
  0x1b   :  { %p876_p11 = scmp.ne.s32.totalorder %s19_s8, %s875_s16  ;;  %p881_p13 = scmp.lt.s32.totalorder %s875_s16, %s875_s16 }
  0x1d   :  { %p882_p0 = por %p881_p13, %p880_p12 }
  0x1f   :  { %p883_p1 = pnand %p882_p0, %p876_p11 }
  0x21   :  { %886 = shalt.err (!%p883_p1)
}
  0x22   :  { %s941_s1 = smov 128   ;;  %s942_s17 = smov 8  }
  0x23   :  { %24 = dma.hbm_to_vmem [thread:$0]  %s1101_s0, 256, %s19_s8, [#allocation3], %s941_s1, %s941_s1, %s942_s17  }
  0x24   :  { %s943_s20 = smov [#allocation7]   ;;  %s887_s24 = scalar_lea.hbm %s1104_s3, 256 }
  0x25   :  { %s44_s21 = sshll.u32 %s943_s20, 4  ;;  %p888_p2 = scmp.ne.s32.totalorder %s1104_s3, %s887_s24  ;;  %s45_s21 = int_to_ptr.vmem [resolvable:$true] %s44_s21 }
  0x26   :  { %p891_p3 = scmp.lt.u32.totalorder %s887_s24, %s1104_s3 }
  0x28   :  { %p893_p4 = pnand %p891_p3, %p888_p2 }
  0x2a   :  { %896 = shalt.err (!%p893_p4)
}
  0x2b   :  { %s897_s6 = scalar_lea.vmem %s45_s21, 256  ;;  %p902_p6 = scmp.lt.s32.totalorder %s45_s21, %s45_s21 }
  0x2c   :  { %p898_p5 = scmp.ne.s32.totalorder %s45_s21, %s897_s6  ;;  %p903_p7 = scmp.lt.s32.totalorder %s897_s6, %s897_s6 }
  0x2e   :  { %p904_p8 = por %p903_p7, %p902_p6 }
  0x30   :  { %p905_p9 = pnand %p904_p8, %p898_p5 }
  0x32   :  { %908 = shalt.err (!%p905_p9)
}
  0x33   :  { %50 = dma.hbm_to_vmem [thread:$0]  %s1104_s3, 256, %s45_s21, [#allocation6], %s938_s28, %s938_s28, %s939_s29  }
  0x34   :  { %931 = dma.done.wait [#allocation3], 256  }
  0x35   :  { %932 = vsyncadd [#allocation3], 4294967040 }
  0x36   :  { %933 = dma.done.wait [#allocation6], 2048  }
  0x37   :  { %934 = vsyncadd [#allocation6], 4294965248  ;;  %v944_v0 = vmov 0.0   ;;  %vm945_vm0 = vmmov 0   ;;  %v827_v1 = vld [vmem:[#allocation5] sm:$0xff]   ;;  %v828_v2 = vld [vmem:[#allocation5 + $0x8] sm:$0xff]  }
  0x38   :  { %753 = vmatprep.subr.bf16.mxu0 %v944_v0  ;;  %757 = vmatprep.mubr.msk.bf16.mxu0 %vm945_vm0, %v944_v0  ;;  %v63_v3 = vld [vmem:[#allocation2] sm:$0xff]  ;;  %v64_v4 = vld [vmem:[#allocation2 + $0x8] sm:$0xff]  ;;  %vm89_vm1 = vcmask 261120   ;;  %v831_v20 = vld [vmem:[#allocation5 + $0x20] sm:$0xff]  }
  0x39   :  { %761 = vmatprep.subr.bf16.mxu1 %v944_v0  ;;  %765 = vmatprep.mubr.msk.bf16.mxu1 %vm945_vm0, %v944_v0  ;;  %v65_v5 = vpack.c.bf16 %v64_v4, %v63_v3  ;;  %v829_v6 = vld [vmem:[#allocation5 + $0x10] sm:$0xff]   ;;  %v830_v7 = vld [vmem:[#allocation5 + $0x18] sm:$0xff]   ;;  %v832_v21 = vld [vmem:[#allocation5 + $0x28] sm:$0xff]  }
  0x3a   :  { %754 = vmatpush3.bf16.msra.mxu0 %v827_v1  ;;  %762 = vmatpush3.bf16.msra.mxu1 %v829_v6  ;;  %v691_v8 = vld [vmem:[%s1103_s2] ss:$0 sm:$0xff]  ;;  %v696_v22 = vld [vmem:[%s1103_s2 + $0x1] ss:$0 sm:$0xff]  ;;  %v834_v35 = vld [vmem:[#allocation5 + $0x38] sm:$0xff]  }
  0x3b   :  { %755 = vmatprep.subr.bf16.mxu0 %v944_v0  ;;  %763 = vmatprep.subr.bf16.mxu1 %v944_v0  ;;  %v833_v34 = vld [vmem:[#allocation5 + $0x30] sm:$0xff]   ;;  %v835_v48 = vld [vmem:[#allocation5 + $0x40] sm:$0xff]   ;;  %v836_v49 = vld [vmem:[#allocation5 + $0x48] sm:$0xff]  }
  0x3c   :  { %v701_v36 = vld [vmem:[%s1103_s2 + $0x2] ss:$0 sm:$0xff]  ;;  %v706_v50 = vld [vmem:[%s1103_s2 + $0x3] ss:$0 sm:$0xff]  ;;  %v838_v63 = vld [vmem:[#allocation5 + $0x58] sm:$0xff]  }
  0x3d   :  { %v837_v62 = vld [vmem:[#allocation5 + $0x50] sm:$0xff]  }
  0x3e   :  { %756 = vmatpush3.bf16.msra.mxu0 %v828_v2  ;;  %764 = vmatpush3.bf16.msra.mxu1 %v830_v7  ;;  %v711_v1 = vld [vmem:[%s1103_s2 + $0x4] ss:$0 sm:$0xff] }
  0x3f   :  { %769 = vmatprep.subr.bf16.mxu0 %v944_v0  ;;  %777 = vmatprep.subr.bf16.mxu1 %v944_v0 }
  0x41   :  { %758 = vmatmul.mubr.msk.bf16.vlgmr.msra.gmra.mrb[0].mxu0 %vm89_vm1, %v65_v5 }
  0x42   :  { %773 = vmatprep.mubr.msk.bf16.mxu0 %vm945_vm0, %v944_v0  ;;  %770 = vmatpush3.bf16.msra.mxu0 %v831_v20 }
  0x43   :  { %771 = vmatprep.subr.bf16.mxu0 %v944_v0 }
  0x46   :  { %772 = vmatpush3.bf16.msra.mxu0 %v832_v21 }
  0x47   :  { %785 = vmatprep.subr.bf16.mxu0 %v944_v0 }
 0x114   :  { %v127_v9 = vpop.f32.mrb[0].mxu0 }
 0x115   :  { %v128_v10 = vadd.f32 %v691_v8, %v127_v9  ;;  %v759_v11 = vpop.f32.mrb[1].mxu0 }
 0x116   :  { %v130_v12 = vpop.f32.mrb[2].mxu0 }
 0x117   :  { %v136_v13 = vmul.f32 0.2, %v128_v10  ;;  %v131_v14 = vadd.f32 %v691_v8, %v130_v12  ;;  %v760_v15 = vpop.f32.mrb[3].mxu0  ;;  %vm134_vm2 = vcmp.ge.f32.partialorder %v128_v10, 0.0 }
 0x118   :  { %v716_v15 = vld [vmem:[%s1103_s2 + $0x5] ss:$0 sm:$0xff] }
 0x119   :  { %vm135_vm3 = vcmp.ge.f32.partialorder %v131_v14, 0.0  ;;  %v137_v16 = vmul.f32 0.2, %v131_v14  ;;  %v138_v17 = vsel %vm134_vm2, %v128_v10, %v136_v13  ;;  %v839_v13 = vld [vmem:[#allocation5 + $0x60] sm:$0xff]   ;;  %vm670_vm2 = vcmask 523264  }
 0x11b   :  { %v139_v18 = vsel %vm135_vm3, %v131_v14, %v137_v16  ;;  %v840_v14 = vld [vmem:[#allocation5 + $0x68] sm:$0xff]  }
 0x11c   :  { %v140_v19 = vpack.c.bf16 %v139_v18, %v138_v17 }
 0x11e   :  { %766 = vmatmul.mubr.msk.bf16.vlgmr.msra.gmra.mrb[0].mxu1 %vm89_vm1, %v140_v19 }
 0x11f   :  { %781 = vmatprep.mubr.msk.bf16.mxu1 %vm945_vm0, %v944_v0  ;;  %778 = vmatpush3.bf16.msra.mxu1 %v833_v34 }
 0x120   :  { %779 = vmatprep.subr.bf16.mxu1 %v944_v0 }
 0x123   :  { %780 = vmatpush3.bf16.msra.mxu1 %v834_v35 }
 0x124   :  { %793 = vmatprep.subr.bf16.mxu1 %v944_v0 }
 0x1f1   :  { %v203_v23 = vpop.f32.mrb[0].mxu1 }
 0x1f2   :  { %v204_v24 = vadd.f32 %v696_v22, %v203_v23  ;;  %v767_v25 = vpop.f32.mrb[1].mxu1 }
 0x1f3   :  { %v206_v26 = vpop.f32.mrb[2].mxu1 }
 0x1f4   :  { %v212_v27 = vmul.f32 0.2, %v204_v24  ;;  %v207_v28 = vadd.f32 %v696_v22, %v206_v26  ;;  %v768_v29 = vpop.f32.mrb[3].mxu1  ;;  %vm210_vm4 = vcmp.ge.f32.partialorder %v204_v24, 0.0 }
 0x1f5   :  { %v721_v29 = vld [vmem:[%s1103_s2 + $0x6] ss:$0 sm:$0xff]  ;;  %s946_s2 = smov [#allocation8]  }
 0x1f6   :  { %vm211_vm5 = vcmp.ge.f32.partialorder %v207_v28, 0.0  ;;  %v213_v30 = vmul.f32 0.2, %v207_v28  ;;  %v214_v31 = vsel %vm210_vm4, %v204_v24, %v212_v27  ;;  %v841_v27 = vld [vmem:[#allocation7] sm:$0xff]   ;;  %s678_s22 = sshll.u32 %s946_s2, 4  ;;  %s679_s22 = int_to_ptr.vmem [resolvable:$true] %s678_s22 }
 0x1f7   :  { %s909_s23 = scalar_lea.vmem %s679_s22, 256  ;;  %p914_p11 = scmp.lt.s32.totalorder %s679_s22, %s679_s22 }
 0x1f8   :  { %v215_v32 = vsel %vm211_vm5, %v207_v28, %v213_v30  ;;  %v842_v28 = vld [vmem:[#allocation7 + $0x8] sm:$0xff]   ;;  %p910_p10 = scmp.ne.s32.totalorder %s679_s22, %s909_s23  ;;  %p915_p12 = scmp.lt.s32.totalorder %s909_s23, %s909_s23 }
 0x1f9   :  { %v216_v33 = vpack.c.bf16 %v215_v32, %v214_v31 }
 0x1fa   :  { %p916_p13 = por %p915_p12, %p914_p11 }
 0x1fb   :  { %774 = vmatmul.mubr.msk.bf16.vlgmr.msra.gmra.mrb[4].mxu0 %vm89_vm1, %v216_v33 }
 0x1fc   :  { %789 = vmatprep.mubr.msk.bf16.mxu0 %vm945_vm0, %v944_v0  ;;  %786 = vmatpush3.bf16.msra.mxu0 %v835_v48  ;;  %p917_p0 = pnand %p916_p13, %p910_p10 }
 0x1fd   :  { %787 = vmatprep.subr.bf16.mxu0 %v944_v0 }
 0x200   :  { %788 = vmatpush3.bf16.msra.mxu0 %v836_v49 }
 0x201   :  { %801 = vmatprep.subr.bf16.mxu0 %v944_v0 }
 0x2ce   :  { %v279_v37 = vpop.f32.mrb[4].mxu0 }
 0x2cf   :  { %v280_v38 = vadd.f32 %v701_v36, %v279_v37  ;;  %v775_v39 = vpop.f32.mrb[5].mxu0 }
 0x2d0   :  { %v282_v40 = vpop.f32.mrb[6].mxu0 }
 0x2d1   :  { %v288_v41 = vmul.f32 0.2, %v280_v38  ;;  %v283_v42 = vadd.f32 %v701_v36, %v282_v40  ;;  %v776_v43 = vpop.f32.mrb[7].mxu0  ;;  %vm286_vm6 = vcmp.ge.f32.partialorder %v280_v38, 0.0 }
 0x2d3   :  { %vm287_vm7 = vcmp.ge.f32.partialorder %v283_v42, 0.0  ;;  %v289_v44 = vmul.f32 0.2, %v283_v42  ;;  %v290_v45 = vsel %vm286_vm6, %v280_v38, %v288_v41 }
 0x2d5   :  { %v291_v46 = vsel %vm287_vm7, %v283_v42, %v289_v44 }
 0x2d6   :  { %v292_v47 = vpack.c.bf16 %v291_v46, %v290_v45 }
 0x2d8   :  { %782 = vmatmul.mubr.msk.bf16.vlgmr.msra.gmra.mrb[4].mxu1 %vm89_vm1, %v292_v47 }
 0x2d9   :  { %797 = vmatprep.mubr.msk.bf16.mxu1 %vm945_vm0, %v944_v0  ;;  %794 = vmatpush3.bf16.msra.mxu1 %v837_v62 }
 0x2da   :  { %795 = vmatprep.subr.bf16.mxu1 %v944_v0 }
 0x2dd   :  { %796 = vmatpush3.bf16.msra.mxu1 %v838_v63 }
 0x2de   :  { %809 = vmatprep.subr.bf16.mxu1 %v944_v0 }
 0x3ab   :  { %v355_v51 = vpop.f32.mrb[4].mxu1 }
 0x3ac   :  { %v356_v52 = vadd.f32 %v706_v50, %v355_v51  ;;  %v783_v53 = vpop.f32.mrb[5].mxu1 }
 0x3ad   :  { %v358_v54 = vpop.f32.mrb[6].mxu1 }
 0x3ae   :  { %v364_v55 = vmul.f32 0.2, %v356_v52  ;;  %v359_v56 = vadd.f32 %v706_v50, %v358_v54  ;;  %v784_v57 = vpop.f32.mrb[7].mxu1  ;;  %vm362_vm8 = vcmp.ge.f32.partialorder %v356_v52, 0.0 }
 0x3b0   :  { %vm363_vm9 = vcmp.ge.f32.partialorder %v359_v56, 0.0  ;;  %v365_v58 = vmul.f32 0.2, %v359_v56  ;;  %v366_v59 = vsel %vm362_vm8, %v356_v52, %v364_v55 }
 0x3b2   :  { %v367_v60 = vsel %vm363_vm9, %v359_v56, %v365_v58 }
 0x3b3   :  { %v368_v61 = vpack.c.bf16 %v367_v60, %v366_v59 }
 0x3b5   :  { %790 = vmatmul.mubr.msk.bf16.vlgmr.msra.gmra.mrb[8].mxu0 %vm89_vm1, %v368_v61 }
 0x3b6   :  { %805 = vmatprep.mubr.msk.bf16.mxu0 %vm945_vm0, %v944_v0  ;;  %802 = vmatpush3.bf16.msra.mxu0 %v839_v13 }
 0x3b7   :  { %803 = vmatprep.subr.bf16.mxu0 %v944_v0 }
 0x3ba   :  { %804 = vmatpush3.bf16.msra.mxu0 %v840_v14 }
 0x488   :  { %v431_v2 = vpop.f32.mrb[8].mxu0 }
 0x489   :  { %v432_v3 = vadd.f32 %v711_v1, %v431_v2  ;;  %v791_v4 = vpop.f32.mrb[9].mxu0 }
 0x48a   :  { %v434_v5 = vpop.f32.mrb[10].mxu0 }
 0x48b   :  { %v440_v6 = vmul.f32 0.2, %v432_v3  ;;  %v435_v7 = vadd.f32 %v711_v1, %v434_v5  ;;  %v792_v8 = vpop.f32.mrb[11].mxu0  ;;  %vm438_vm10 = vcmp.ge.f32.partialorder %v432_v3, 0.0 }
 0x48d   :  { %vm439_vm11 = vcmp.ge.f32.partialorder %v435_v7, 0.0  ;;  %v441_v9 = vmul.f32 0.2, %v435_v7  ;;  %v442_v10 = vsel %vm438_vm10, %v432_v3, %v440_v6 }
 0x48f   :  { %v443_v11 = vsel %vm439_vm11, %v435_v7, %v441_v9 }
 0x490   :  { %v444_v12 = vpack.c.bf16 %v443_v11, %v442_v10 }
 0x492   :  { %798 = vmatmul.mubr.msk.bf16.vlgmr.msra.gmra.mrb[8].mxu1 %vm89_vm1, %v444_v12 }
 0x493   :  { %813 = vmatprep.mubr.msk.bf16.mxu1 %vm945_vm0, %v944_v0  ;;  %810 = vmatpush3.bf16.msra.mxu1 %v841_v27 }
 0x494   :  { %811 = vmatprep.subr.bf16.mxu1 %v944_v0  ;;  %v725_v0 = vld [vmem:[%s1105_s4] ss:$0 sm:$0xff] }
 0x497   :  { %812 = vmatpush3.bf16.msra.mxu1 %v842_v28 }
 0x565   :  { %v507_v16 = vpop.f32.mrb[8].mxu1 }
 0x566   :  { %v508_v17 = vadd.f32 %v716_v15, %v507_v16  ;;  %v799_v18 = vpop.f32.mrb[9].mxu1 }
 0x567   :  { %v510_v19 = vpop.f32.mrb[10].mxu1 }
 0x568   :  { %v516_v20 = vmul.f32 0.2, %v508_v17  ;;  %v511_v21 = vadd.f32 %v716_v15, %v510_v19  ;;  %v800_v22 = vpop.f32.mrb[11].mxu1  ;;  %vm514_vm12 = vcmp.ge.f32.partialorder %v508_v17, 0.0 }
 0x56a   :  { %vm515_vm13 = vcmp.ge.f32.partialorder %v511_v21, 0.0  ;;  %v517_v23 = vmul.f32 0.2, %v511_v21  ;;  %v518_v24 = vsel %vm514_vm12, %v508_v17, %v516_v20 }
 0x56c   :  { %v519_v25 = vsel %vm515_vm13, %v511_v21, %v517_v23 }
 0x56d   :  { %v520_v26 = vpack.c.bf16 %v519_v25, %v518_v24 }
 0x56f   :  { %806 = vmatmul.mubr.msk.bf16.vlgmr.msra.gmra.mrb[12].mxu0 %vm89_vm1, %v520_v26 }
 0x642   :  { %v583_v30 = vpop.f32.mrb[12].mxu0 }
 0x643   :  { %v584_v31 = vadd.f32 %v721_v29, %v583_v30  ;;  %v807_v32 = vpop.f32.mrb[13].mxu0 }
 0x644   :  { %v586_v33 = vpop.f32.mrb[14].mxu0 }
 0x645   :  { %v592_v34 = vmul.f32 0.2, %v584_v31  ;;  %v587_v35 = vadd.f32 %v721_v29, %v586_v33  ;;  %v808_v36 = vpop.f32.mrb[15].mxu0  ;;  %vm590_vm14 = vcmp.ge.f32.partialorder %v584_v31, 0.0 }
 0x647   :  { %vm591_vm15 = vcmp.ge.f32.partialorder %v587_v35, 0.0  ;;  %v593_v37 = vmul.f32 0.2, %v587_v35  ;;  %v594_v38 = vsel %vm590_vm14, %v584_v31, %v592_v34 }
 0x649   :  { %v595_v39 = vsel %vm591_vm15, %v587_v35, %v593_v37 }
 0x64a   :  { %v596_v40 = vpack.c.bf16 %v595_v39, %v594_v38 }
 0x64c   :  { %814 = vmatmul.mubr.msk.bf16.vlgmr.msra.gmra.mrb[12].mxu1 %vm89_vm1, %v596_v40 }
 0x71f   :  { %v657_v41 = vpop.f32.mrb[12].mxu1 }
 0x720   :  { %v658_v42 = vadd.f32 %v725_v0, %v657_v41  ;;  %v815_v43 = vpop.f32.mrb[13].mxu1 }
 0x721   :  { %v660_v44 = vpop.f32.mrb[14].mxu1 }
 0x722   :  { %vm664_vm0 = vcmp.ge.f32.partialorder %v658_v42, 0.0  ;;  %v666_v45 = vmul.f32 0.2, %v658_v42  ;;  %v661_v46 = vadd.f32 %v725_v0, %v660_v44  ;;  %v816_v47 = vpop.f32.mrb[15].mxu1 }
 0x724   :  { %v668_v48 = vsel %vm664_vm0, %v658_v42, %v666_v45  ;;  %vm665_vm3 = vcmp.ge.f32.partialorder %v661_v46, 0.0  ;;  %v667_v49 = vmul.f32 0.2, %v661_v46 }
 0x725   :  { %671 = vst.msk [vmem:[#allocation8] sm:$0xff] %vm670_vm2, %v668_v48 }
 0x726   :  { %v669_v50 = vsel %vm665_vm3, %v661_v46, %v667_v49 }
 0x727   :  { %672 = vst.msk [vmem:[#allocation8 + $0x8] sm:$0xff] %vm670_vm2, %v669_v50 }
 0x728   :  { %920 = shalt.err (!%p917_p0)
}
 0x729   :  { %s921_s25 = scalar_lea.hbm %s1106_s5, 256 }
 0x72a   :  { %p922_p1 = scmp.ne.s32.totalorder %s1106_s5, %s921_s25  ;;  %p925_p2 = scmp.lt.u32.totalorder %s921_s25, %s1106_s5 }
 0x72c   :  { %p927_p3 = pnand %p925_p2, %p922_p1 }
 0x72e   :  { %930 = shalt.err (!%p927_p3)
}
 0x72f   :  { %684 = dma.vmem_to_hbm [thread:$0]  %s679_s22, 256, %s1106_s5, [#allocation4], %s941_s1, %s941_s1, %s942_s17  }
 0x730   :  { %935 = dma.done.wait [#allocation4], 256  }
 0x731   :  { %936 = vsyncadd [#allocation4], 4294967040 }
 0x732   :  { %688 = vsyncpa [#allocation3], 1 }
 0x733   :  { %689 = vsyncpa [#allocation6], 1 }
 0x734   :  { %690 = vsyncpa [#allocation4], 1 }

</bundles_post_ra>
